<compile_context>
chip_gen: v6e
topology: v6e:2x2x1
jax: 0.10.0
libtpu: 0.0.40
codegen_flags: <defaults>
</compile_context>

<pallas_src>
import functools

import jax
import jax.numpy as jnp
from jax import lax
from jax.experimental import pallas as pl
from jax.experimental.pallas import tpu as pltpu


def _attention_kernel(x_ref, wqkv_ref, wo_ref, bo_ref, o_ref, *,
                      heads, dim_head, scale):
    # Per grid step (one batch element):
    #   x_ref    : (1, N, dim)
    #   wqkv_ref : (heads, dim, 3*dim_head)   heads-major per-head QKV weights
    #   wo_ref   : (heads, dim_head, dim)     heads-major output-proj weights
    #   bo_ref   : (1, dim)
    #   o_ref    : (1, N, dim)
    x = x_ref[0]                                        # (N, dim), native dtype
    n, dim = x.shape
    dh = dim_head

    # Replicate x across a leading heads axis so every matmul below is a
    # leading-batch-dim dot_general (MXU-friendly, no transposes needed).
    xb = jnp.broadcast_to(x, (heads, n, dim))           # (H, N, dim)

    # Per-head QKV projection, f32 accumulation on the MXU.
    qkv = lax.dot_general(
        xb, wqkv_ref[...],
        dimension_numbers=(((2,), (1,)), ((0,), (0,))),
        preferred_element_type=jnp.float32)             # (H, N, 3*dh), f32

    q = qkv[:, :, 0 * dh:1 * dh] * scale                # scale folded into Q
    k = qkv[:, :, 1 * dh:2 * dh]
    v = qkv[:, :, 2 * dh:3 * dh]

    # scores[h] = q[h] @ k[h].T  -- contraction on the last dims of both
    # operands, so no explicit transpose is materialized.
    dots = lax.dot_general(
        q, k,
        dimension_numbers=(((2,), (2,)), ((0,), (0,))),
        preferred_element_type=jnp.float32)             # (H, N, N)

    dots = dots - jnp.max(dots, axis=-1, keepdims=True)
    e = jnp.exp(dots)
    denom = jnp.sum(e, axis=-1, keepdims=True)
    attn = e * pl.reciprocal(denom, approx=False)       # exact softmax

    # out[h] = attn[h] @ v[h]
    # (for bf16 inputs one would cast attn to the bf16 MXU path here)
    out = lax.dot_general(
        attn, v,
        dimension_numbers=(((2,), (1,)), ((0,), (0,))),
        preferred_element_type=jnp.float32)             # (H, N, dh)

    # Output projection per head; the head-merge (concat in the reference)
    # becomes a sum over the heads axis -- no jnp.concatenate, no relayout.
    yh = lax.dot_general(
        out, wo_ref[...],
        dimension_numbers=(((2,), (1,)), ((0,), (0,))),
        preferred_element_type=jnp.float32)             # (H, N, dim)

    y = yh[0]
    for h in range(1, heads):                           # tiny static unroll (VPU adds)
        y = y + yh[h]

    y = y + bo_ref[...]                                 # (1, dim) broadcasts over N
    o_ref[0] = y.astype(o_ref.dtype)


def attention_pallas(x, w_qkv, w_out, b_out, *, heads, dim_head):
    """x: (B, N, dim) -> (B, N, dim).  Weights in PyTorch-transposed layout."""
    B, N, dim = x.shape
    inner = heads * dim_head
    scale = dim_head ** (-0.5)

    # Host-side layout prep (pure reshape/transpose, outside the kernel):
    #   w_qkv (dim, 3*inner), column = part*inner + h*dh + d
    #     -> (heads, dim, 3*dh), last index = part*dh + d
    w_qkv_h = jnp.transpose(
        w_qkv.reshape(dim, 3, heads, dim_head), (2, 0, 1, 3)
    ).reshape(heads, dim, 3 * dim_head)
    #   w_out (inner, dim), row = h*dh + d  ->  (heads, dh, dim)
    w_out_h = w_out.reshape(heads, dim_head, dim)

    kernel = functools.partial(
        _attention_kernel, heads=heads, dim_head=dim_head, scale=scale)

    # Advisory cost estimate for XLA scheduling around the custom call.
    flops = 2 * B * (N * dim * 3 * inner          # QKV projection
                     + 2 * heads * N * N * dim_head  # QK^T and attn@V
                     + N * inner * dim)           # output projection
    transcendentals = B * heads * N * N           # exp in softmax
    itemsize = jnp.dtype(x.dtype).itemsize
    bytes_accessed = itemsize * (2 * B * N * dim          # x in, y out
                                 + dim * 3 * inner        # w_qkv
                                 + inner * dim            # w_out
                                 + dim)                   # bias

    return pl.pallas_call(
        kernel,
        out_shape=jax.ShapeDtypeStruct((B, N, dim), x.dtype),
        grid_spec=pltpu.PrefetchScalarGridSpec(
            num_scalar_prefetch=0,
            grid=(B,),
            in_specs=[
                pl.BlockSpec((1, N, dim), lambda b: (b, 0, 0)),
                pl.BlockSpec((heads, dim, 3 * dim_head), lambda b: (0, 0, 0)),
                pl.BlockSpec((heads, dim_head, dim), lambda b: (0, 0, 0)),
                pl.BlockSpec((1, dim), lambda b: (0, 0)),
            ],
            out_specs=pl.BlockSpec((1, N, dim), lambda b: (b, 0, 0)),
        ),
        compiler_params=pltpu.CompilerParams(
            dimension_semantics=("parallel",)),
        cost_estimate=pl.CostEstimate(
            flops=flops,
            transcendentals=transcendentals,
            bytes_accessed=bytes_accessed),
    )(x, w_qkv_h, w_out_h, b_out)


def attention_ref(x, w_qkv, w_out, b_out, *, heads, dim_head):
    """Pure-JAX reference mirroring the PyTorch forward."""
    B, N, dim = x.shape
    inner = heads * dim_head
    scale = dim_head ** (-0.5)
    qkv = jnp.einsum("bnd,de->bne", x, w_qkv)
    q, k, v = jnp.split(qkv, 3, axis=-1)

    def split_heads(t):
        return t.reshape(B, N, heads, dim_head).transpose(0, 2, 1, 3)

    q, k, v = map(split_heads, (q, k, v))
    dots = jnp.einsum("bhnd,bhmd->bhnm", q, k) * scale
    attn = jax.nn.softmax(dots, axis=-1)
    out = jnp.einsum("bhnm,bhmd->bhnd", attn, v)
    out = out.transpose(0, 2, 1, 3).reshape(B, N, inner)
    return jnp.einsum("bne,ed->bnd", out, w_out) + b_out[0]


if __name__ == "__main__":
    # Small, deterministic config
    B, N, dim = 2, 8, 32
    heads, dim_head = 4, 16
    inner = heads * dim_head

    key = jax.random.PRNGKey(0)
    kx, kq, ko, kb = jax.random.split(key, 4)

    x = jax.random.normal(kx, (B, N, dim), dtype=jnp.float32)
    # Deterministic "trained" parameters (PyTorch Linear weights, pre-transposed)
    w_qkv = jax.random.normal(kq, (dim, 3 * inner), dtype=jnp.float32) * 0.05
    w_out = jax.random.normal(ko, (inner, dim), dtype=jnp.float32) * 0.05
    b_out = jax.random.normal(kb, (1, dim), dtype=jnp.float32) * 0.05

    y = attention_pallas(x, w_qkv, w_out, b_out, heads=heads, dim_head=dim_head)
    y = jax.block_until_ready(y)

    y_ref = attention_ref(x, w_qkv, w_out, b_out, heads=heads, dim_head=dim_head)
    assert jnp.allclose(y, y_ref, atol=1e-4, rtol=1e-4), "mismatch vs reference"

    print("KERNEL_OK")
</pallas_src>

<mosaic_0001>
module attributes {stable_mosaic.version = 11 : i64} {
  func.func @_attention_kernel(%arg0: i32, %arg1: memref<1x8x32xf32, #tpu.memory_space<vmem>>, %arg2: memref<4x32x48xf32, #tpu.memory_space<vmem>>, %arg3: memref<4x16x32xf32, #tpu.memory_space<vmem>>, %arg4: memref<1x32xf32, #tpu.memory_space<vmem>>, %arg5: memref<1x8x32xf32, #tpu.memory_space<vmem>>) attributes {dimension_semantics = [#tpu.dimension_semantics<parallel>], iteration_bounds = array<i64: 2>, scalar_prefetch = 0 : i64, scratch_operands = 0 : i64, tpu.core_type = #tpu.core_type<tc>, window_params = [{transform_indices = @transform_0, window_bounds = array<i64: 1, 8, 32>}, {pipeline_mode = #tpu.pipeline_mode<synchronous>, transform_indices = @transform_1, window_bounds = array<i64: 4, 32, 48>}, {pipeline_mode = #tpu.pipeline_mode<synchronous>, transform_indices = @transform_2, window_bounds = array<i64: 4, 16, 32>}, {pipeline_mode = #tpu.pipeline_mode<synchronous>, transform_indices = @transform_3, window_bounds = array<i64: 1, 32>}, {transform_indices = @transform_4, window_bounds = array<i64: 1, 8, 32>}]} {
    %c0 = arith.constant 0 : index
    %c0_0 = arith.constant 0 : index
    %c0_1 = arith.constant 0 : index
    %0 = vector.load %arg1[%c0, %c0_0, %c0_1] : memref<1x8x32xf32, #tpu.memory_space<vmem>>, vector<1x8x32xf32>
    %1 = vector.shape_cast %0 : vector<1x8x32xf32> to vector<8x32xf32>
    %2 = vector.shape_cast %1 : vector<8x32xf32> to vector<1x8x32xf32>
    %3 = vector.broadcast %2 : vector<1x8x32xf32> to vector<4x8x32xf32>
    %c0_2 = arith.constant 0 : index
    %c0_3 = arith.constant 0 : index
    %c0_4 = arith.constant 0 : index
    %4 = vector.load %arg2[%c0_2, %c0_3, %c0_4] : memref<4x32x48xf32, #tpu.memory_space<vmem>>, vector<4x32x48xf32>
    %cst = arith.constant dense<0.000000e+00> : vector<4x8x48xf32>
    %5 = tpu.matmul %3, %4, %cst {dimension_numbers = #tpu.dot_dimension_numbers<[2], [1], [1], [2], [0, 0, 0, 1, 1, 2], [0], [0]>} : vector<4x8x32xf32>, vector<4x32x48xf32>, vector<4x8x48xf32> -> vector<4x8x48xf32>
    %6 = vector.extract_strided_slice %5 {offsets = [0, 0, 0], sizes = [4, 8, 16], strides = [1, 1, 1]} : vector<4x8x48xf32> to vector<4x8x16xf32>
    %cst_5 = arith.constant 2.500000e-01 : f32
    %7 = vector.broadcast %cst_5 : f32 to vector<4x8x16xf32>
    %8 = arith.mulf %6, %7 : vector<4x8x16xf32>
    %9 = vector.extract_strided_slice %5 {offsets = [0, 0, 16], sizes = [4, 8, 16], strides = [1, 1, 1]} : vector<4x8x48xf32> to vector<4x8x16xf32>
    %10 = vector.extract_strided_slice %5 {offsets = [0, 0, 32], sizes = [4, 8, 16], strides = [1, 1, 1]} : vector<4x8x48xf32> to vector<4x8x16xf32>
    %cst_6 = arith.constant dense<0.000000e+00> : vector<4x8x8xf32>
    %11 = tpu.matmul %8, %9, %cst_6 {dimension_numbers = #tpu.dot_dimension_numbers<[2], [2], [1], [1], [0, 0, 0, 1, 1, 1], [0], [0]>} : vector<4x8x16xf32>, vector<4x8x16xf32>, vector<4x8x8xf32> -> vector<4x8x8xf32>
    %cst_7 = arith.constant dense<0xFF800000> : vector<4x8xf32>
    %12 = vector.multi_reduction <maximumf>, %11, %cst_7 [2] : vector<4x8x8xf32> to vector<4x8xf32>
    %13 = vector.shape_cast %12 : vector<4x8xf32> to vector<4x8x1xf32>
    %14 = vector.broadcast %13 : vector<4x8x1xf32> to vector<4x8x8xf32>
    %15 = arith.subf %11, %14 : vector<4x8x8xf32>
    %16 = math.exp %15 : vector<4x8x8xf32>
    %cst_8 = arith.constant dense<0.000000e+00> : vector<4x8xf32>
    %17 = vector.multi_reduction <add>, %16, %cst_8 [2] : vector<4x8x8xf32> to vector<4x8xf32>
    %18 = vector.shape_cast %17 : vector<4x8xf32> to vector<4x8x1xf32>
    %19 = tpu.reciprocal %18 : vector<4x8x1xf32> -> vector<4x8x1xf32>
    %20 = vector.broadcast %19 : vector<4x8x1xf32> to vector<4x8x8xf32>
    %21 = arith.mulf %16, %20 : vector<4x8x8xf32>
    %cst_9 = arith.constant dense<0.000000e+00> : vector<4x8x16xf32>
    %22 = tpu.matmul %21, %10, %cst_9 {dimension_numbers = #tpu.dot_dimension_numbers<[2], [1], [1], [2], [0, 0, 0, 1, 1, 2], [0], [0]>} : vector<4x8x8xf32>, vector<4x8x16xf32>, vector<4x8x16xf32> -> vector<4x8x16xf32>
    %c0_10 = arith.constant 0 : index
    %c0_11 = arith.constant 0 : index
    %c0_12 = arith.constant 0 : index
    %23 = vector.load %arg3[%c0_10, %c0_11, %c0_12] : memref<4x16x32xf32, #tpu.memory_space<vmem>>, vector<4x16x32xf32>
    %cst_13 = arith.constant dense<0.000000e+00> : vector<4x8x32xf32>
    %24 = tpu.matmul %22, %23, %cst_13 {dimension_numbers = #tpu.dot_dimension_numbers<[2], [1], [1], [2], [0, 0, 0, 1, 1, 2], [0], [0]>} : vector<4x8x16xf32>, vector<4x16x32xf32>, vector<4x8x32xf32> -> vector<4x8x32xf32>
    %25 = vector.extract_strided_slice %24 {offsets = [0, 0, 0], sizes = [1, 8, 32], strides = [1, 1, 1]} : vector<4x8x32xf32> to vector<1x8x32xf32>
    %26 = vector.shape_cast %25 : vector<1x8x32xf32> to vector<8x32xf32>
    %27 = vector.extract_strided_slice %24 {offsets = [1, 0, 0], sizes = [1, 8, 32], strides = [1, 1, 1]} : vector<4x8x32xf32> to vector<1x8x32xf32>
    %28 = vector.shape_cast %27 : vector<1x8x32xf32> to vector<8x32xf32>
    %29 = arith.addf %26, %28 : vector<8x32xf32>
    %30 = vector.extract_strided_slice %24 {offsets = [2, 0, 0], sizes = [1, 8, 32], strides = [1, 1, 1]} : vector<4x8x32xf32> to vector<1x8x32xf32>
    %31 = vector.shape_cast %30 : vector<1x8x32xf32> to vector<8x32xf32>
    %32 = arith.addf %29, %31 : vector<8x32xf32>
    %33 = vector.extract_strided_slice %24 {offsets = [3, 0, 0], sizes = [1, 8, 32], strides = [1, 1, 1]} : vector<4x8x32xf32> to vector<1x8x32xf32>
    %34 = vector.shape_cast %33 : vector<1x8x32xf32> to vector<8x32xf32>
    %35 = arith.addf %32, %34 : vector<8x32xf32>
    %c0_14 = arith.constant 0 : index
    %c0_15 = arith.constant 0 : index
    %36 = vector.load %arg4[%c0_14, %c0_15] : memref<1x32xf32, #tpu.memory_space<vmem>>, vector<1x32xf32>
    %37 = vector.broadcast %36 : vector<1x32xf32> to vector<8x32xf32>
    %38 = arith.addf %35, %37 : vector<8x32xf32>
    %c0_16 = arith.constant 0 : index
    %c0_17 = arith.constant 0 : index
    %c0_18 = arith.constant 0 : index
    %39 = vector.load %arg5[%c0_16, %c0_17, %c0_18] : memref<1x8x32xf32, #tpu.memory_space<vmem>>, vector<1x8x32xf32>
    %40 = vector.shape_cast %39 : vector<1x8x32xf32> to vector<8x32xf32>
    %41 = vector.shape_cast %38 : vector<8x32xf32> to vector<1x8x32xf32>
    tpu.vector_store %arg5[%c0_16, %c0_17, %c0_18], %41 {strides = array<i32>} : memref<1x8x32xf32, #tpu.memory_space<vmem>>, vector<1x8x32xf32>,
    return
  }
  func.func @transform_0(%arg0: i32) -> (i32, i32, i32) {
    %c0_i32 = arith.constant 0 : i32
    %c0_i32_0 = arith.constant 0 : i32
    %c0_i32_1 = arith.constant 0 : i32
    return %arg0, %c0_i32, %c0_i32_0 : i32, i32, i32
  }
  func.func @transform_1(%arg0: i32) -> (i32, i32, i32) {
    %c0_i32 = arith.constant 0 : i32
    %c0_i32_0 = arith.constant 0 : i32
    %c0_i32_1 = arith.constant 0 : i32
    %c0_i32_2 = arith.constant 0 : i32
    return %c0_i32, %c0_i32_0, %c0_i32_1 : i32, i32, i32
  }
  func.func @transform_2(%arg0: i32) -> (i32, i32, i32) {
    %c0_i32 = arith.constant 0 : i32
    %c0_i32_0 = arith.constant 0 : i32
    %c0_i32_1 = arith.constant 0 : i32
    %c0_i32_2 = arith.constant 0 : i32
    return %c0_i32, %c0_i32_0, %c0_i32_1 : i32, i32, i32
  }
  func.func @transform_3(%arg0: i32) -> (i32, i32) {
    %c0_i32 = arith.constant 0 : i32
    %c0_i32_0 = arith.constant 0 : i32
    %c0_i32_1 = arith.constant 0 : i32
    return %c0_i32, %c0_i32_0 : i32, i32
  }
  func.func @transform_4(%arg0: i32) -> (i32, i32, i32) {
    %c0_i32 = arith.constant 0 : i32
    %c0_i32_0 = arith.constant 0 : i32
    %c0_i32_1 = arith.constant 0 : i32
    return %arg0, %c0_i32, %c0_i32_0 : i32, i32, i32
  }
}

</mosaic_0001>

<bundles_post_ra>
// kernel: tpu_custom_call.1
= control target key start
LH: loop header
LB: loop body
LE: loop exit
PB: predicated region body
PF: predicated region fallthrough
CT: control target
= control target key end

     0   :  { %9 = vsyncpa [#allocation3], 0  ;;  %s2379_s0 = inlined_call_operand.hbm [shape: f32[2,8,32], index: 0, kind: input, shape index: {}]   ;;  %s2380_s1 = inlined_call_operand.hbm [shape: f32[4,32,48], index: 1, kind: input, shape index: {}]   ;;  %s2381_s2 = inlined_call_operand.hbm [shape: f32[4,16,32], index: 2, kind: input, shape index: {}]   ;;  %s2382_s3 = inlined_call_operand.vmem [shape: f32[1,32], index: 3, kind: input, shape index: {}]   ;;  %s2383_s4 = inlined_call_operand.hbm [shape: f32[2,8,32], index: 4, kind: output, shape index: {}]  }
   0x1   :  { %11 = vsyncpa [#allocation3 + $0x1], 0 }
   0x2   :  { %12 = vsyncpa [#allocation6], 0 }
   0x3   :  { %13 = vsyncpa [#allocation4], 0 }
   0x4   :  { %15 = vsyncpa [#allocation4 + $0x1], 0  ;;  %s2095_s15 = smov 0   ;;  %s2097_s16 = smov 0  }
   0x5   :  { %s2099_s17 = smov 0   ;;  %s2101_s18 = smov 0  }
   0x6 LB: > { %s2116_s19 = sadd.s32 4294967295, %s2058_s18   ;;  %s1624_s20 = sadd.s32 4294967294, %s2058_s18   ;;  %s2058_s18 = sphi %s2101_s18, %s2405_s18   ;;  %s2054_s17 = sphi %s2099_s17, %s2404_s17   ;;  %s2050_s16 = sphi %s2097_s16, %s2403_s16   ;;  %s2046_s15 = sphi %s2095_s15, %s2402_s15  }
   0x7   : > { %p41_p0 = scmp.ne.s32.totalorder %s2050_s16, %s2046_s15  ;;  %p2384_p1 = scmp.eq.s32.totalorder %s2116_s19, 0 }
   0x8   : > { %p134_p3 = scmp.eq.s32.totalorder %s1624_s20, 1  ;;  %p1625_p5 = scmp.ge.s32.totalorder %s2058_s18, 1 }
   0x9   : > { %p2125_p4 = por %p2384_p1, %p41_p0  ;;  %p141_p7 = scmp.lt.s32.totalorder %s2058_s18, 3 }
   0xa   : > { %p2130_p6 = por %p134_p3, %p41_p0  ;;  %s2060_s24 = smov [#allocation5]  }
   0xb   : > { %s2388_s21 = scalar_select %p2125_p4, 1, 0 }
   0xc   : > { %s2389_s22 = scalar_select %p2130_p6, 1, 0 }
   0xd   : > { %p2135_p8 = pnand %p1625_p5, %p141_p7  ;;  %s153_s25 = sshll.u32 %s2060_s24, 4  ;;  %s154_s25 = int_to_ptr.vmem [resolvable:$true] %s153_s25 }
   0xe   : > { %s2061_s27 = smov [#allocation7]   ;;  %s1921_s29 = scalar_lea.vmem %s154_s25, 2048 }
   0xf   : > { %s2390_s23 = scalar_select %p2135_p8, 1, 0 }
  0x10   : > { %p1833_p9 = pneg %p2135_p8  ;;  %s166_s28 = sshll.u32 %s2061_s27, 4  ;;  %s167_s28 = int_to_ptr.vmem [resolvable:$true] %s166_s28 }
  0x11   : > { %p1922_p13 = scmp.ne.s32.totalorder %s154_s25, %s1921_s29  ;;  %p1929_p5 = scmp.lt.s32.totalorder %s154_s25, %s154_s25 }
  0x12   : > { %p2144_p11 = pnand %p1833_p9, %p2384_p1  ;;  %p1930_p7 = scmp.lt.s32.totalorder %s1921_s29, %s1921_s29 }
  0x14   : > { %p1912_p12 = pneg %p2144_p11  ;;  %p1931_p10 = por %p1930_p7, %p1929_p5 }
  0x16   : > { %p1924_p0 = pnand %p1922_p13, %p1912_p12 }
  0x18   : > { %p1925_p3 = pneg %p1924_p0 }
  0x1a   : > { %p1932_p9 = pnand %p1931_p10, %p1925_p3 }
  0x1c   : > { %1935 = shalt.err (!%p1932_p9)
}
  0x1d   : > { %s2062_s30 = smov 128   ;;  %s2063_s5 = smov 8  }
  0x1e   : > { %1836 = dma.hbm_to_vmem [thread:$0]  (!%p2144_p11), %s2380_s1, 2048, %s154_s25, [#allocation6], %s2062_s30, %s2062_s30, %s2063_s5  }
  0x1f   : > { %s1947_s8 = scalar_lea.vmem %s167_s28, 1024  ;;  %p1955_p2 = scmp.lt.s32.totalorder %s167_s28, %s167_s28 }
  0x20   : > { %p1948_p1 = scmp.ne.s32.totalorder %s167_s28, %s1947_s8  ;;  %p1956_p6 = scmp.lt.s32.totalorder %s1947_s8, %s1947_s8 }
  0x22   : > { %p1950_p13 = pnand %p1948_p1, %p1912_p12  ;;  %p1957_p5 = por %p1956_p6, %p1955_p2 }
  0x24   : > { %p1951_p0 = pneg %p1950_p13 }
  0x26   : > { %p1958_p10 = pnand %p1957_p5, %p1951_p0 }
  0x28   : > { %1961 = shalt.err (!%p1958_p10)
}
  0x29   : > { %1839 = dma.hbm_to_vmem [thread:$0]  (!%p2144_p11), %s2381_s2, 1024, %s167_s28, [#allocation6], %s2062_s30, %s2062_s30, %s2063_s5  }
  0x2a   : > { %s2167_s11 = sadd.s32 1, %s2058_s18   ;;  %s28_s12 = sadd.s32 1, %s2054_s17 }
  0x2b   : > { %s25_s13 = ssub.s32 %s2058_s18, %s2167_s11  ;;  %p35_p1 = scmp.ne.s32.totalorder %s2054_s17, %s2050_s16 }
  0x2c   : > { %p26_p2 = scmp.eq.s32.totalorder %s25_s13, 0  ;;  %p36_p6 = scmp.eq.s32.totalorder %s2058_s18, 0 }
  0x2d   : > { %p2392_p12 = scmp.eq.s32.totalorder %s2116_s19, 1  ;;  %p1850_p7 = scmp.lt.s32.totalorder %s2058_s18, 2 }
  0x2e   : > { %s2183_s20 = scalar_select %p26_p2, %s2054_s17, %s28_s12  }
  0x2f   : > { %p2177_p3 = por %p2392_p12, %p35_p1  ;;  %p37_p9 = por %p36_p6, %p35_p1 }
  0x30   : > { %s183_s24 = sand.u32 1, %s2054_s17   ;;  %s1630_s26 = sshll.u32 %s2058_s18, 7 }
  0x31   : > { %s2393_s14 = scalar_select %p2177_p3, 1, 0 }
  0x32   : > { %s1629_s25 = sshll.u32 %s183_s24, 3  ;;  %s2190_s29 = scalar_lea.hbm %s2379_s0, %s1630_s26 }
  0x33   : > { %s187_s30 = scalar_lea.vmem [#allocation2], %s1629_s25  ;;  %p2192_p11 = pnand %p1850_p7, %p37_p9 }
  0x34   : > { %s194_s5 = sshll.u32 %s187_s30, 4  ;;  %s184_s7 = scalar_lea.sflag [#allocation3], %s183_s24  ;;  %s195_s5 = int_to_ptr.vmem [resolvable:$true] %s194_s5 }
  0x35   : > { %s1962_s8 = scalar_lea.hbm %s2190_s29, 128  ;;  %p1964_p0 = pneg %p2192_p11 }
  0x36   : > { %p1963_p13 = scmp.ne.s32.totalorder %s2190_s29, %s1962_s8  ;;  %s1967_s12 = scalar_lea.hbm %s2379_s0, 256 }
  0x37   : > { %p1968_p1 = scmp.lt.s32.totalorder %s2190_s29, %s2379_s0  ;;  %p1969_p2 = scmp.lt.s32.totalorder %s1967_s12, %s1962_s8 }
  0x38   : > { %p1965_p5 = pnand %p1964_p0, %p1963_p13 }
  0x39   : > { %p1970_p6 = por %p1969_p2, %p1968_p1 }
  0x3a   : > { %p1966_p10 = pneg %p1965_p5 }
  0x3c   : > { %p1971_p12 = pnand %p1970_p6, %p1966_p10 }
  0x3e   : > { %1974 = shalt.err (!%p1971_p12)
}
  0x3f   : > { %s1975_s26 = scalar_lea.vmem %s195_s5, 128  ;;  %s2064_s24 = smov [#allocation2]  }
  0x40   : > { %p1976_p7 = scmp.ne.s32.totalorder %s195_s5, %s1975_s26  ;;  %s1980_s27 = sshll.u32 %s2064_s24, 4  ;;  %s1981_s27 = int_to_ptr.vmem [resolvable:$false] %s1980_s27 }
  0x41   : > { %s1982_s28 = scalar_lea.vmem %s1981_s27, 256  ;;  %p1983_p13 = scmp.lt.s32.totalorder %s195_s5, %s1981_s27 }
  0x42   : > { %p1978_p9 = pnand %p1976_p7, %p1964_p0  ;;  %p1984_p5 = scmp.lt.s32.totalorder %s1982_s28, %s1975_s26 }
  0x44   : > { %p1979_p3 = pneg %p1978_p9  ;;  %p1985_p4 = por %p1984_p5, %p1983_p13 }
  0x46   : > { %p1986_p8 = pnand %p1985_p4, %p1979_p3 }
  0x48   : > { %1989 = shalt.err (!%p1986_p8)
}
  0x49   : > { %1843 = dma.hbm_to_vmem [thread:$0]  (!%p2192_p11), %s2190_s29, 128, %s195_s5, %s184_s7  }
  0x4a   : > { %p2395_p10 = scmp.ne.s32.totalorder %s2390_s23, 0 }
  0x4b   : > { %s2213_s30 = sand.u32 (!%p2395_p10), 1, %s2050_s16   ;;  %p2396_p4 = scmp.ne.s32.totalorder (!%p2395_p10), %s2388_s21, 0 }
  0x4c   : > { %203 = sbr.rel (%p2395_p10) target bundleno = 1326 (0x52e), region = 36  ;;  %s1632_s8 = sshll.u32 (!%p2395_p10), %s2213_s30, 3 }
  0x4d   : > { %s206_s9 = scalar_lea.sflag (!%p2395_p10), [#allocation3], %s2213_s30  ;;  %s209_s10 = scalar_lea.vmem (!%p2395_p10), [#allocation2], %s1632_s8 }
  0x51   : > { %2033 = dma.done.wait (%p2396_p4), %s206_s9, 128  }
  0x52   : > { %2035 = vsyncadd (%p2396_p4), %s206_s9, 4294967168  ;;  %p2397_p8 = scmp.eq.s32.totalorder %s2116_s19, 0 }
  0x54   : > { %2037 = dma.done.wait (%p2397_p8), [#allocation6], 3072   ;;  %p2398_p3 = pmov %p2397_p8 }
  0x55   : > { %v2065_v0 = vmov 0.0   ;;  %vm2066_vm0 = vmmov 0   ;;  %v246_v1 = vld [vmem:[#allocation5 + $0x18] sm:$0xff]  ;;  %v245_v2 = vld [vmem:[#allocation5 + $0x10] sm:$0xff]  ;;  %v244_v5 = vld [vmem:[#allocation5 + $0x8] sm:$0xff]  ;;  %vm259_vm1 = vcmask 261120  }
  0x56   : > { %2039 = vsyncadd (%p2398_p3), [#allocation6], 4294964224  ;;  %1709 = vmatprep.subr.mxu0 %v2065_v0  ;;  %1720 = vmatprep.subr.mxu1 %v2065_v0  ;;  %v250_v3 = vld [vmem:[#allocation5 + $0x38] sm:$0xff]  ;;  %v249_v4 = vld [vmem:[#allocation5 + $0x30] sm:$0xff]  ;;  %s2067_s21 = smov 112   ;;  %vm550_vm2 = vcmask 130048  }
  0x57   : > { %1717 = vmatprep.mubr.msk.f32.mxu0 %vm2066_vm0, %v2065_v0  ;;  %1728 = vmatprep.mubr.msk.f32.mxu1 %vm2066_vm0, %v2065_v0  ;;  %v248_v6 = vld [vmem:[#allocation5 + $0x28] sm:$0xff]  ;;  %v243_v7 = vld [vmem:[#allocation5] sm:$0xff]  ;;  %v242_v9 = vld [vmem:[%s209_s10] sm:$0xff]  ;;  %vm860_vm3 = vcmask 64512   ;;  %s2068_s23 = smov 96   ;;  %s1658_s6 = sshll.u32 %s2116_s19, 7 }
  0x58   : > { %1710 = vmatpush3.msra.mxu0 %v246_v1  ;;  %1721 = vmatpush3.msra.mxu1 %v250_v3  ;;  %v247_v8 = vld [vmem:[#allocation5 + $0x20] sm:$0xff]  ;;  %v254_v10 = vld [vmem:[#allocation5 + $0x58] sm:$0xff]  ;;  %v253_v11 = vld [vmem:[#allocation5 + $0x50] sm:$0xff]  ;;  %s241_s7 = scalar_lea.vmem [#allocation8], %s1632_s8  ;;  %s1533_s26 = scalar_lea.hbm %s2383_s4, %s1658_s6 }
  0x59   : > { %1711 = vmatprep.subr.mxu0 %v2065_v0  ;;  %1722 = vmatprep.subr.mxu1 %v2065_v0  ;;  %v258_v12 = vld [vmem:[#allocation5 + $0x78] sm:$0xff]  ;;  %v252_v13 = vld [vmem:[#allocation5 + $0x48] sm:$0xff]  ;;  %v257_v14 = vld [vmem:[#allocation5 + $0x70] sm:$0xff]  ;;  %s1535_s12 = sshll.u32 %s241_s7, 4  ;;  %s1522_s24 = scalar_lea.sflag [#allocation4], %s2213_s30  ;;  %s1536_s12 = int_to_ptr.vmem [resolvable:$true] %s1535_s12 }
  0x5a   : > { %1712 = vmatpush3.msra.mxu0 %v245_v2  ;;  %1723 = vmatpush3.msra.mxu1 %v249_v4  ;;  %v251_v15 = vld [vmem:[#allocation5 + $0x40] sm:$0xff]  ;;  %v256_v16 = vld [vmem:[#allocation5 + $0x68] sm:$0xff]  ;;  %s1990_s27 = scalar_lea.vmem %s1536_s12, 128  ;;  %p2399_p0 = scmp.ne.s32.totalorder %s2393_s14, 0 }
  0x5b   : > { %1713 = vmatprep.subr.mxu0 %v2065_v0  ;;  %1724 = vmatprep.subr.mxu1 %v2065_v0  ;;  %v255_v17 = vld [vmem:[#allocation5 + $0x60] sm:$0xff]  ;;  %p1991_p11 = scmp.ne.s32.totalorder %s1536_s12, %s1990_s27  ;;  %s2069_s19 = smov [#allocation8]  }
  0x5c   : > { %1714 = vmatpush3.msra.mxu0 %v244_v5  ;;  %1725 = vmatpush3.msra.mxu1 %v248_v6  ;;  %s1994_s28 = sshll.u32 %s2069_s19, 4  ;;  %s1995_s28 = int_to_ptr.vmem [resolvable:$false] %s1994_s28 }
  0x5d   : > { %1715 = vmatprep.subr.mxu0 %v2065_v0  ;;  %1726 = vmatprep.subr.mxu1 %v2065_v0  ;;  %p1992_p1 = pnand %p1991_p11, %p2399_p0  ;;  %s1996_s8 = scalar_lea.vmem %s1995_s28, 256 }
  0x5e   : > { %1716 = vmatpush3.msra.mxu0 %v243_v7  ;;  %1727 = vmatpush3.msra.mxu1 %v247_v8  ;;  %p1997_p6 = scmp.lt.s32.totalorder %s1536_s12, %s1995_s28  ;;  %p1998_p12 = scmp.lt.s32.totalorder %s1996_s8, %s1990_s27 }
  0x5f   : > { %1718 = vmatmul.mubr.msk.f32.vlgmr.msra.gmra.mxu0 %vm259_vm1, %v242_v9  ;;  %1731 = vmatprep.subr.mxu0 %v2065_v0  ;;  %p1993_p2 = pneg %p1992_p1 }
  0x60   : > { %1732 = vmatpush3.msra.mxu0 %v254_v10  ;;  %1742 = vmatprep.subr.mxu1 %v2065_v0  ;;  %p1999_p7 = por %p1998_p12, %p1997_p6 }
  0x61   : > { %1733 = vmatprep.subr.mxu0 %v2065_v0  ;;  %1729 = vmatmul.mubr.msk.f32.vlgmr.msra.gmra.mxu1 %vm259_vm1, %v242_v9 }
  0x62   : > { %1734 = vmatpush3.msra.mxu0 %v253_v11  ;;  %1743 = vmatpush3.msra.mxu1 %v258_v12  ;;  %p2000_p9 = pnand %p1999_p7, %p1993_p2 }
  0x63   : > { %1735 = vmatprep.subr.mxu0 %v2065_v0  ;;  %1744 = vmatprep.subr.mxu1 %v2065_v0 }
  0x64   : > { %1736 = vmatpush3.msra.mxu0 %v252_v13  ;;  %1745 = vmatpush3.msra.mxu1 %v257_v14 }
  0x65   : > { %1737 = vmatprep.subr.mxu0 %v2065_v0  ;;  %1746 = vmatprep.subr.mxu1 %v2065_v0 }
  0x66   : > { %1738 = vmatpush3.msra.mxu0 %v251_v15  ;;  %1739 = vmatprep.mubr.msk.f32.mxu0 %vm2066_vm0, %v2065_v0 }
  0x67   : > { %1747 = vmatpush3.msra.mxu1 %v256_v16  ;;  %1740 = vmatmul.mubr.msk.f32.vlgmr.msra.gmra.mxu0 %vm259_vm1, %v242_v9 }
  0x68   : > { %1748 = vmatprep.subr.mxu1 %v2065_v0  ;;  %1750 = vmatprep.mubr.msk.f32.mxu1 %vm2066_vm0, %v2065_v0 }
  0x69   : > { %1749 = vmatpush3.msra.mxu1 %v255_v17  ;;  %1753 = vmatprep.subr.mxu0 %v2065_v0  ;;  %v1210_v17 = vld [vmem:[#allocation7 + $0x8] sm:$0xff] }
  0x6a   : > { %1751 = vmatmul.mubr.msk.f32.vlgmr.msra.gmra.mxu1 %vm259_vm1, %v242_v9  ;;  %1755 = vmatprep.mubr.msk.f32.mxu0 %vm2066_vm0, %v2065_v0 }
  0x6b   : > { %1758 = vmatprep.subr.mxu1 %v2065_v0  ;;  %1760 = vmatprep.mubr.msk.f32.mxu1 %vm2066_vm0, %v2065_v0 }
 0x11f   : > { %v329_v18 = vpop.f32.mrf.mxu0 }
 0x120   : > { %548 = vrot.lane.b32.xlu0 %v329_v18, %s2067_s21  ;;  %v543_v27 = vmul.f32 0.25, %v329_v18 }
 0x121   : > { %v1719_v19 = vpop.f32.mrf.mxu0  ;;  %v2261_v20 = vpop.f32.mrf.mxu1 }
 0x122   : > { %v544_v29 = vmul.f32 0.25, %v2261_v20 }
 0x123   : > { %v1730_v21 = vpop.f32.mrf.mxu1 }
 0x124   : > { %627 = vrot.lane.b32.xlu0 %v2261_v20, %s2067_s21  ;;  %v1212_v21 = vld [vmem:[#allocation7 + $0x18] sm:$0xff] }
 0x127   : > { %v2264_v22 = vpop.f32.mrf.mxu0 }
 0x128   : > { %705 = vrot.lane.b32.xlu1 %v2264_v22, %s2067_s21  ;;  %v545_v31 = vmul.f32 0.25, %v2264_v22 }
 0x129   : > { %v1741_v23 = vpop.f32.mrf.mxu0 }
 0x12a   : > { %v2267_v24 = vpop.f32.mrf.mxu1  ;;  %v1214_v23 = vld [vmem:[#allocation7 + $0x28] sm:$0xff] }
 0x12b   : > { %v546_v33 = vmul.f32 0.25, %v2267_v24 }
 0x12c   : > { %v1752_v25 = vpop.f32.mrf.mxu1  ;;  %783 = vrot.lane.b32.xlu1 %v2267_v24, %s2067_s21 }
 0x12d   : > { %v1213_v25 = vld [vmem:[#allocation7 + $0x20] sm:$0xff] }
 0x192   : > { %v549_v26 = vpop.permute.xlu0 %548 }
 0x193   : > { %1754 = vmatpush3.xpose.msk.msra.mxu0 %vm550_vm2, %v549_v26 }
 0x194   : > { %1763 = vmatprep.subr.mxu0 %v2065_v0 }
 0x196   : > { %v628_v28 = vpop.permute.xlu0 %627  ;;  %1756 = vmatmul.mubr.msk.f32.vlgmr.msra.gmra.mxu0 %vm550_vm2, %v543_v27  ;;  %v1216_v27 = vld [vmem:[#allocation7 + $0x38] sm:$0xff] }
 0x197   : > { %1759 = vmatpush3.xpose.msk.msra.mxu1 %vm550_vm2, %v628_v28  ;;  %1765 = vmatprep.mubr.msk.f32.mxu0 %vm2066_vm0, %v2065_v0 }
 0x198   : > { %1768 = vmatprep.subr.mxu1 %v2065_v0 }
 0x19a   : > { %1761 = vmatmul.mubr.msk.f32.vlgmr.msra.gmra.mxu1 %vm550_vm2, %v544_v29  ;;  %v706_v30 = vpop.permute.xlu1 %705  ;;  %v1215_v29 = vld [vmem:[#allocation7 + $0x30] sm:$0xff] }
 0x19b   : > { %1764 = vmatpush3.xpose.msk.msra.mxu0 %vm550_vm2, %v706_v30  ;;  %1770 = vmatprep.mubr.msk.f32.mxu1 %vm2066_vm0, %v2065_v0 }
 0x19c   : > { %1773 = vmatprep.subr.mxu0 %v2065_v0 }
 0x19e   : > { %v784_v32 = vpop.permute.xlu1 %783  ;;  %1766 = vmatmul.mubr.msk.f32.vlgmr.msra.gmra.mxu0 %vm550_vm2, %v545_v31 }
 0x19f   : > { %1769 = vmatpush3.xpose.msk.msra.mxu1 %vm550_vm2, %v784_v32  ;;  %1775 = vmatprep.mubr.msk.f32.mxu0 %vm2066_vm0, %v2065_v0 }
 0x1a0   : > { %1778 = vmatprep.subr.mxu1 %v2065_v0 }
 0x1a2   : > { %1771 = vmatmul.mubr.msk.f32.vlgmr.msra.gmra.mxu1 %vm550_vm2, %v546_v33 }
 0x1a3   : > { %1780 = vmatprep.mubr.msk.f32.mxu1 %vm2066_vm0, %v2065_v0 }
 0x256   : > { %v622_v34 = vpop.f32.mrf.mxu0 }
 0x257   : > { %v861_v35 = vsel %vm860_vm3, %v622_v34, -inf }
 0x258   : > { %862 = vmax.xlane.f32.xlu0 %v861_v35  ;;  %v1757_v36 = vpop.f32.mrf.mxu0 }
 0x25a   : > { %v700_v37 = vpop.f32.mrf.mxu1 }
 0x25b   : > { %v864_v38 = vsel %vm860_vm3, %v700_v37, -inf }
 0x25c   : > { %v1762_v39 = vpop.f32.mrf.mxu1  ;;  %865 = vmax.xlane.f32.xlu1 %v864_v38 }
 0x25e   : > { %v778_v40 = vpop.f32.mrf.mxu0 }
 0x25f   : > { %v867_v41 = vsel %vm860_vm3, %v778_v40, -inf }
 0x260   : > { %868 = vmax.xlane.f32.xlu0 %v867_v41  ;;  %v1767_v42 = vpop.f32.mrf.mxu0 }
 0x262   : > { %v856_v43 = vpop.f32.mrf.mxu1 }
 0x263   : > { %v870_v44 = vsel %vm860_vm3, %v856_v43, -inf }
 0x264   : > { %v1772_v45 = vpop.f32.mrf.mxu1  ;;  %871 = vmax.xlane.f32.xlu0 %v870_v44 }
 0x26d   : > { %905 = vrot.lane.b32.xlu1 %v329_v18, %s2068_s23 }
 0x2e1   : > { %v863_v46 = vpop.xlane.xlu0 %862 }
 0x2e2   : > { %v873_v47 = vsub.f32 %v622_v34, %v863_v46 }
 0x2e4   : > { %v877_v48 = vmul.f32 1.442695, %v873_v47 }
 0x2e5   : > { %v866_v49 = vpop.xlane.xlu1 %865 }
 0x2e6   : > { %1894 = vpow2.f32 %v877_v48  ;;  %v874_v50 = vsub.f32 %v700_v37, %v866_v49 }
 0x2e8   : > { %v879_v51 = vmul.f32 1.442695, %v874_v50 }
 0x2e9   : > { %v906_v52 = vpop.permute.xlu1 %905  ;;  %v869_v53 = vpop.xlane.xlu0 %868 }
 0x2ea   : > { %1896 = vpow2.f32 %v879_v51  ;;  %v875_v54 = vsub.f32 %v778_v40, %v869_v53  ;;  %1774 = vmatpush3.msra.mxu0 %v906_v52 }
 0x2eb   : > { %1783 = vmatprep.subr.mxu0 %v2065_v0 }
 0x2ec   : > { %v881_v55 = vmul.f32 1.442695, %v875_v54 }
 0x2ed   : > { %v872_v56 = vpop.xlane.xlu0 %871 }
 0x2ee   : > { %1898 = vpow2.f32 %v881_v55  ;;  %v876_v57 = vsub.f32 %v856_v43, %v872_v56  ;;  %v1656_v43 = vld [vmem:[%s2382_s3] ss:$0 sm:$0xff] }
 0x2f0   : > { %v883_v58 = vmul.f32 1.442695, %v876_v57 }
 0x2f2   : > { %1900 = vpow2.f32 %v883_v58 }
 0x2f3   : > { %v1895_v59 = vpop.eup %1894 }
 0x2f4   : > { %v885_v60 = vsel %vm860_vm3, %v1895_v59, 0.0 }
 0x2f5   : > { %886 = vadd.xlane.f32.xlu1 %v885_v60 }
 0x2f7   : > { %v1897_v61 = vpop.eup %1896 }
 0x2f8   : > { %v888_v62 = vsel %vm860_vm3, %v1897_v61, 0.0 }
 0x2f9   : > { %889 = vadd.xlane.f32.xlu0 %v888_v62 }
 0x2fb   : > { %v1899_v63 = vpop.eup %1898 }
 0x2fc   : > { %v891_v1 = vsel %vm860_vm3, %v1899_v63, 0.0 }
 0x2fd   : > { %892 = vadd.xlane.f32.xlu1 %v891_v1 }
 0x2ff   : > { %v1901_v2 = vpop.eup %1900 }
 0x300   : > { %v894_v3 = vsel %vm860_vm3, %v1901_v2, 0.0 }
 0x301   : > { %895 = vadd.xlane.f32.xlu0 %v894_v3 }
 0x30e   : > { %1057 = vrot.lane.b32.xlu1 %v2264_v22, %s2068_s23  ;;  %v1211_v22 = vld [vmem:[#allocation7 + $0x10] sm:$0xff] }
 0x312   : > { %1133 = vrot.lane.b32.xlu1 %v2267_v24, %s2068_s23 }
 0x317   : > { %981 = vrot.lane.b32.xlu0 %v2261_v20, %s2068_s23  ;;  %v1209_v20 = vld [vmem:[#allocation7] sm:$0xff] }
 0x37e   : > { %v887_v4 = vpop.xlane.xlu1 %886 }
 0x37f   : > { %1902 = vrcp.f32 %v887_v4 }
 0x382   : > { %v890_v5 = vpop.xlane.xlu0 %889 }
 0x383   : > { %1904 = vrcp.f32 %v890_v5 }
 0x386   : > { %v893_v6 = vpop.xlane.xlu1 %892 }
 0x387   : > { %1906 = vrcp.f32 %v893_v6 }
 0x38a   : > { %v896_v7 = vpop.xlane.xlu0 %895  ;;  %v1058_v9 = vpop.permute.xlu1 %1057 }
 0x38b   : > { %1908 = vrcp.f32 %v896_v7 }
 0x38c   : > { %v1903_v8 = vpop.eup %1902 }
 0x38d   : > { %v901_v10 = vmul.f32 %v1903_v8, %v1895_v59 }
 0x38e   : > { %v982_v11 = vpop.permute.xlu0 %981  ;;  %v1134_v14 = vpop.permute.xlu1 %1133 }
 0x38f   : > { %1776 = vmatmul.mubr.msk.f32.vlgmr.msra.gmra.mxu0 %vm860_vm3, %v901_v10  ;;  %1779 = vmatpush3.msra.mxu1 %v982_v11 }
 0x390   : > { %v1905_v12 = vpop.eup %1904  ;;  %1784 = vmatpush3.msra.mxu0 %v1058_v9  ;;  %1788 = vmatprep.subr.mxu1 %v2065_v0 }
 0x391   : > { %v902_v13 = vmul.f32 %v1905_v12, %v1897_v61  ;;  %1785 = vmatprep.mubr.msk.f32.mxu0 %vm2066_vm0, %v2065_v0  ;;  %1793 = vmatprep.subr.mxu0 %v2065_v0 }
 0x393   : > { %1781 = vmatmul.mubr.msk.f32.vlgmr.msra.gmra.mxu1 %vm860_vm3, %v902_v13 }
 0x394   : > { %v1907_v15 = vpop.eup %1906  ;;  %1789 = vmatpush3.msra.mxu1 %v1134_v14  ;;  %1790 = vmatprep.mubr.msk.f32.mxu1 %vm2066_vm0, %v2065_v0 }
 0x395   : > { %v903_v16 = vmul.f32 %v1907_v15, %v1899_v63  ;;  %1800 = vmatprep.subr.mxu1 %v2065_v0 }
 0x397   : > { %1786 = vmatmul.mubr.msk.f32.vlgmr.msra.gmra.mxu0 %vm860_vm3, %v903_v16 }
 0x398   : > { %v1909_v18 = vpop.eup %1908  ;;  %1794 = vmatpush3.msra.mxu0 %v1210_v17  ;;  %1797 = vmatprep.mubr.msk.f32.mxu0 %vm2066_vm0, %v2065_v0 }
 0x399   : > { %v904_v19 = vmul.f32 %v1909_v18, %v1901_v2  ;;  %1795 = vmatprep.subr.mxu0 %v2065_v0 }
 0x39a   : > { %1796 = vmatpush3.msra.mxu0 %v1209_v20 }
 0x39b   : > { %1791 = vmatmul.mubr.msk.f32.vlgmr.msra.gmra.mxu1 %vm860_vm3, %v904_v19  ;;  %1807 = vmatprep.subr.mxu0 %v2065_v0 }
 0x39c   : > { %1804 = vmatprep.mubr.msk.f32.mxu1 %vm2066_vm0, %v2065_v0  ;;  %1801 = vmatpush3.msra.mxu1 %v1212_v21 }
 0x39d   : > { %1802 = vmatprep.subr.mxu1 %v2065_v0 }
 0x39e   : > { %1803 = vmatpush3.msra.mxu1 %v1211_v22 }
 0x39f   : > { %1814 = vmatprep.subr.mxu1 %v2065_v0 }
 0x44f   : > { %v977_v24 = vpop.f32.mrf.mxu0 }
 0x450   : > { %1798 = vmatmul.mubr.msk.f32.vlgmr.msra.gmra.mxu0 %vm550_vm2, %v977_v24 }
 0x451   : > { %v1777_v26 = vpop.f32.mrf.mxu0  ;;  %1808 = vmatpush3.msra.mxu0 %v1214_v23  ;;  %1811 = vmatprep.mubr.msk.f32.mxu0 %vm2066_vm0, %v2065_v0 }
 0x452   : > { %1809 = vmatprep.subr.mxu0 %v2065_v0 }
 0x453   : > { %v1053_v28 = vpop.f32.mrf.mxu1  ;;  %1810 = vmatpush3.msra.mxu0 %v1213_v25 }
 0x454   : > { %1805 = vmatmul.mubr.msk.f32.vlgmr.msra.gmra.mxu1 %vm550_vm2, %v1053_v28 }
 0x455   : > { %v1782_v30 = vpop.f32.mrf.mxu1  ;;  %1815 = vmatpush3.msra.mxu1 %v1216_v27  ;;  %1818 = vmatprep.mubr.msk.f32.mxu1 %vm2066_vm0, %v2065_v0 }
 0x456   : > { %1816 = vmatprep.subr.mxu1 %v2065_v0 }
 0x457   : > { %v1129_v31 = vpop.f32.mrf.mxu0  ;;  %1817 = vmatpush3.msra.mxu1 %v1215_v29 }
 0x458   : > { %1812 = vmatmul.mubr.msk.f32.vlgmr.msra.gmra.mxu0 %vm550_vm2, %v1129_v31 }
 0x459   : > { %v1787_v32 = vpop.f32.mrf.mxu0 }
 0x45b   : > { %v1205_v33 = vpop.f32.mrf.mxu1 }
 0x45c   : > { %1819 = vmatmul.mubr.msk.f32.vlgmr.msra.gmra.mxu1 %vm550_vm2, %v1205_v33 }
 0x45d   : > { %v1792_v34 = vpop.f32.mrf.mxu1 }
 0x510   : > { %v1286_v35 = vpop.f32.mrf.mxu0 }
 0x512   : > { %v1799_v36 = vpop.f32.mrf.mxu0 }
 0x514   : > { %v1359_v37 = vpop.f32.mrf.mxu1 }
 0x515   : > { %v1509_v40 = vadd.f32 %v1359_v37, %v1286_v35 }
 0x516   : > { %v1806_v38 = vpop.f32.mrf.mxu1 }
 0x518   : > { %v1432_v39 = vpop.f32.mrf.mxu0 }
 0x519   : > { %v1510_v0 = vadd.f32 %v1509_v40, %v1432_v39 }
 0x51a   : > { %v1813_v41 = vpop.f32.mrf.mxu0 }
 0x51c   : > { %v1505_v42 = vpop.f32.mrf.mxu1 }
 0x51d   : > { %v1511_v44 = vadd.f32 %v1510_v0, %v1505_v42 }
 0x51e   : > { %v1820_v45 = vpop.f32.mrf.mxu1 }
 0x51f   : > { %v1519_v46 = vadd.f32 %v1656_v43, %v1511_v44 }
 0x521   : > { %1520 = vst.msk [vmem:[%s241_s7] sm:$0xff] %vm259_vm1, %v1519_v46 }
 0x522   : > { %2003 = shalt.err (!%p2000_p9)
}
 0x523   : > { %s2004_s9 = scalar_lea.hbm %s1533_s26, 128  ;;  %s2008_s21 = scalar_lea.hbm %s2383_s4, 256 }
 0x524   : > { %p2005_p13 = scmp.ne.s32.totalorder %s1533_s26, %s2004_s9  ;;  %p2009_p4 = scmp.lt.s32.totalorder %s1533_s26, %s2383_s4 }
 0x525   : > { %p2010_p8 = scmp.lt.s32.totalorder %s2008_s21, %s2004_s9 }
 0x526   : > { %p2006_p5 = pnand %p2005_p13, %p2399_p0 }
 0x527   : > { %p2011_p3 = por %p2010_p8, %p2009_p4 }
 0x528   : > { %p2007_p10 = pneg %p2006_p5 }
 0x52a   : > { %p2012_p11 = pnand %p2011_p3, %p2007_p10 }
 0x52c   : > { %2015 = shalt.err (!%p2012_p11)
}
 0x52d   : > { %1831 = dma.vmem_to_hbm [thread:$0]  (%p2399_p0), %s1536_s12, 128, %s1533_s26, %s1522_s24  }
 0x52e PF: > { %s1547_s5 = sand.u32 1, %s2046_s15   ;;  %p2400_p1 = scmp.ne.s32.totalorder %s2389_s22, 0 }
 0x52f   : > { %p2401_p2 = scmp.ge.s32.totalorder %s2058_s18, 2  ;;  %s1548_s6 = scalar_lea.sflag [#allocation4], %s1547_s5 }
 0x531   : > { %p1845_p6 = pnand %p2401_p2, %p2400_p1 }
 0x533   : > { %p1846_p12 = pneg %p1845_p6 }
 0x535   : > { %2041 = dma.done.wait (%p1846_p12), %s1548_s6, 128  }
 0x536   : > { %2043 = vsyncadd (%p1846_p12), %s1548_s6, 4294967168  ;;  %p18_p7 = scmp.ge.s32.totalorder %s2167_s11, 4   ;;  %s2402_s15 = smov %s2050_s16 }
 0x537   : > { %s2403_s16 = smov %s2054_s17  ;;  %s2404_s17 = smov %s2183_s20 }
 0x538   : > { %s2405_s18 = smov %s2167_s11  ;;  %20 = sbr.rel (!%p18_p7) target bundleno = 6 (0x6), region = 89 }
 0x53d   :  { %1553 = vsyncpa [#allocation3], 1 }
 0x53e   :  { %1555 = vsyncpa [#allocation3 + $0x1], 1 }
 0x53f   :  { %1556 = vsyncpa [#allocation6], 1 }
 0x540   :  { %1557 = vsyncpa [#allocation4], 1 }
 0x541   :  { %1559 = vsyncpa [#allocation4 + $0x1], 1 }

</bundles_post_ra>
